<compile_context>
chip_gen: v5e
topology: v5e:2x2
jax: 0.10.0
libtpu: 0.0.40
codegen_flags: <defaults>
</compile_context>

<pallas_src>
import functools

import jax
import jax.numpy as jnp
from jax import lax
from jax.experimental import pallas as pl
from jax.experimental.pallas import tpu as pltpu

LANE = 128            # TPU lane width (last-dim vector width)
MAX_ROWS_DERIV = 2048 # rows per block for the streaming derivative kernel (3 MiB/block)
MAX_ROWS_EULER = 256  # rows per block for the fused Euler kernel (register/VMEM friendly)


# ----------------------------------------------------------------------------
# Kernel bodies (beta / gamma / dt / n_steps baked in as compile-time consts)
# ----------------------------------------------------------------------------
def _scalar_deriv_kernel(beta, gamma, y_ref, o_ref):
    # y_ref / o_ref: SMEM refs of shape (3,) float32 — pure scalar-unit work.
    S = y_ref[0]
    I = y_ref[1]
    dS = -beta * S * I
    dR = gamma * I
    dI = -dS - dR
    o_ref[0] = dS
    o_ref[1] = dI
    o_ref[2] = dR


def _batched_deriv_kernel(beta, gamma, y_ref, o_ref):
    # y_ref / o_ref: VMEM tiles of shape (3, rows, 128).
    # Each species is a full dense (rows, 128) tile -> dense vregs,
    # unmasked full-vreg stores.
    S = y_ref[0]
    I = y_ref[1]
    dS = -beta * S * I
    dR = gamma * I
    dI = -dS - dR
    o_ref[0] = dS
    o_ref[1] = dI
    o_ref[2] = dR


def _scalar_euler_kernel(beta, gamma, dt, n_steps, y_ref, o_ref):
    # Whole integration loop fused inside one kernel; state lives in sregs.
    def body(_, carry):
        S, I, R = carry
        dS = -beta * S * I
        dR = gamma * I
        dI = -dS - dR
        return (S + dt * dS, I + dt * dI, R + dt * dR)

    S, I, R = lax.fori_loop(
        0, n_steps, body, (y_ref[0], y_ref[1], y_ref[2]), unroll=8
    )
    o_ref[0] = S
    o_ref[1] = I
    o_ref[2] = R


def _batched_euler_kernel(beta, gamma, dt, n_steps, y_ref, o_ref):
    # y_ref / o_ref: VMEM tiles of shape (3, rows, 128).
    # HBM is read once (tile in) and written once (tile out); all n_steps
    # derivative evaluations happen on the VMEM/vreg-resident carry.
    def body(_, carry):
        S, I, R = carry
        dS = -beta * S * I
        dR = gamma * I
        dI = -dS - dR
        return (S + dt * dS, I + dt * dI, R + dt * dR)

    S, I, R = lax.fori_loop(0, n_steps, body, (y_ref[0], y_ref[1], y_ref[2]))
    o_ref[0] = S
    o_ref[1] = I
    o_ref[2] = R


# ----------------------------------------------------------------------------
# Tiling helper
# ----------------------------------------------------------------------------
def _tile_rows(batch, max_rows):
    """Return (rows_blk, rows_pad) for a batch of `batch` systems.

    The batch is packed 128-per-row.  If the resulting number of rows fits in
    one block, the block equals the full array (no (8,128) divisibility
    requirement).  Otherwise rows are padded up to a multiple of `max_rows`
    (itself a multiple of 8) and tiled with rows_blk = max_rows.
    """
    rows = -(-batch // LANE)  # ceil(batch / 128)
    if rows <= max_rows:
        return rows, rows
    rows_blk = max_rows
    rows_pad = -(-rows // rows_blk) * rows_blk
    return rows_blk, rows_pad


# ----------------------------------------------------------------------------
# Wrapper
# ----------------------------------------------------------------------------
class ODESIRModelPallas:
    """JAX/Pallas equivalent of the PyTorch ODESIRModel."""

    def __init__(self, beta, gamma):
        self.beta = float(beta)
        self.gamma = float(gamma)

        # --- single-system derivative (matches PyTorch forward exactly) ---
        scalar_kernel = functools.partial(
            _scalar_deriv_kernel, self.beta, self.gamma
        )
        scalar_call = pl.pallas_call(
            scalar_kernel,
            out_shape=jax.ShapeDtypeStruct((3,), jnp.float32),
            in_specs=[pl.BlockSpec(memory_space=pltpu.SMEM)],
            out_specs=pl.BlockSpec(memory_space=pltpu.SMEM),
        )
        self._forward_single = jax.jit(scalar_call)

        # --- batched derivative (jitted; specializes per batch size) ---
        self._forward_batched = jax.jit(self._batched_deriv)

        # caches of jitted fused-integrator calls keyed by (dt, n_steps, kind)
        self._integrators = {}

    # ---------------- batched derivative ----------------
    def _batched_deriv(self, y):
        # y: (3, B) float32, batch on the last axis.
        B = y.shape[1]
        rows_blk, rows_pad = _tile_rows(B, MAX_ROWS_DERIV)
        Bp = rows_pad * LANE

        # Pad the tail (B need not be a multiple of 128) and repack to a
        # sublane-dense (3, rows, 128) layout.
        y3 = jnp.pad(y, ((0, 0), (0, Bp - B))).reshape(3, rows_pad, LANE)

        block_bytes = 3 * rows_blk * LANE * 4
        # in + out, double-buffered, plus headroom; never below the default
        # scoped limit so it stays safe on every generation (v7x: 64 MiB phys).
        vmem_bytes = max(2 * 2 * block_bytes + (4 << 20), 32 << 20)

        kern = functools.partial(_batched_deriv_kernel, self.beta, self.gamma)
        out = pl.pallas_call(
            kern,
            out_shape=jax.ShapeDtypeStruct((3, rows_pad, LANE), jnp.float32),
            grid=(rows_pad // rows_blk,),
            in_specs=[pl.BlockSpec((3, rows_blk, LANE), lambda i: (0, i, 0))],
            out_specs=pl.BlockSpec((3, rows_blk, LANE), lambda i: (0, i, 0)),
            compiler_params=pltpu.CompilerParams(
                dimension_semantics=("parallel",),
                vmem_limit_bytes=vmem_bytes,
            ),
        )(y3)
        return out.reshape(3, Bp)[:, :B]

    # ---------------- forward ----------------
    def __call__(self, t, y):
        # t is unused (faithful to the PyTorch forward).
        del t
        y = jnp.asarray(y, dtype=jnp.float32)
        if y.ndim == 1:
            if y.shape[0] != 3:
                raise ValueError(f"expected y of shape (3,), got {y.shape}")
            return self._forward_single(y)
        if y.ndim != 2 or y.shape[0] != 3:
            raise ValueError(f"expected y of shape (3, B), got {y.shape}")
        return self._forward_batched(y)

    # ---------------- fused Euler integration ----------------
    def _make_scalar_integrator(self, dt, n_steps):
        kern = functools.partial(
            _scalar_euler_kernel, self.beta, self.gamma, dt, n_steps
        )
        call = pl.pallas_call(
            kern,
            out_shape=jax.ShapeDtypeStruct((3,), jnp.float32),
            in_specs=[pl.BlockSpec(memory_space=pltpu.SMEM)],
            out_specs=pl.BlockSpec(memory_space=pltpu.SMEM),
        )
        return jax.jit(call)

    def _make_batched_integrator(self, dt, n_steps):
        beta, gamma = self.beta, self.gamma

        def run(y):
            B = y.shape[1]
            rows_blk, rows_pad = _tile_rows(B, MAX_ROWS_EULER)
            Bp = rows_pad * LANE
            y3 = jnp.pad(y, ((0, 0), (0, Bp - B))).reshape(3, rows_pad, LANE)
            kern = functools.partial(
                _batched_euler_kernel, beta, gamma, dt, n_steps
            )
            out = pl.pallas_call(
                kern,
                out_shape=jax.ShapeDtypeStruct(
                    (3, rows_pad, LANE), jnp.float32
                ),
                grid=(rows_pad // rows_blk,),
                in_specs=[
                    pl.BlockSpec((3, rows_blk, LANE), lambda i: (0, i, 0))
                ],
                out_specs=pl.BlockSpec(
                    (3, rows_blk, LANE), lambda i: (0, i, 0)
                ),
                compiler_params=pltpu.CompilerParams(
                    dimension_semantics=("parallel",)
                ),
            )(y3)
            return out.reshape(3, Bp)[:, :B]

        return jax.jit(run)

    def integrate_euler(self, y0, dt, n_steps):
        """Forward-Euler integration fully fused inside one pallas_call.

        Accepts y0 of shape (3,) (single system, scalar SMEM path) or
        (3, B) (ensemble; each tile is integrated entirely on-chip and HBM is
        touched only once per tile for input and output).
        """
        y0 = jnp.asarray(y0, dtype=jnp.float32)
        kind = "scalar" if y0.ndim == 1 else "batched"
        key = (float(dt), int(n_steps), kind)
        if key not in self._integrators:
            if kind == "scalar":
                self._integrators[key] = self._make_scalar_integrator(
                    key[0], key[1]
                )
            else:
                if y0.shape[0] != 3:
                    raise ValueError(
                        f"expected y0 of shape (3, B), got {y0.shape}"
                    )
                self._integrators[key] = self._make_batched_integrator(
                    key[0], key[1]
                )
        return self._integrators[key](y0)


# ----------------------------------------------------------------------------
# Demo / correctness check
# ----------------------------------------------------------------------------
if __name__ == "__main__":
    beta, gamma = 0.3, 0.1
    model = ODESIRModelPallas(beta, gamma)

    key = jax.random.PRNGKey(0)
    k1, k2 = jax.random.split(key)
    t = jnp.float32(0.0)

    # 1) single-system forward (exact PyTorch-module semantics)
    y = jax.random.uniform(k1, (3,), dtype=jnp.float32)  # [S, I, R]
    dy = jax.block_until_ready(model(t, y))
    S, I = y[0], y[1]
    dS = -beta * S * I
    dR = gamma * I
    dI = -dS - dR
    ref = jnp.stack([dS, dI, dR])
    assert dy.shape == (3,) and dy.dtype == jnp.float32
    assert jnp.allclose(dy, ref, atol=1e-6, rtol=1e-6)

    # 2) batched forward: B independent SIR systems, B NOT a multiple of 128
    #    to exercise the pad/slice tail handling.
    B = 200
    yb = jax.random.uniform(k2, (3, B), dtype=jnp.float32)
    dyb = jax.block_until_ready(model(t, yb))
    Sb, Ib = yb[0], yb[1]
    dSb = -beta * Sb * Ib
    dRb = gamma * Ib
    dIb = -dSb - dRb
    refb = jnp.stack([dSb, dIb, dRb])
    assert dyb.shape == (3, B) and dyb.dtype == jnp.float32
    assert jnp.allclose(dyb, refb, atol=1e-6, rtol=1e-6)

    # 3) fused scalar Euler integration: N derivative evals, ONE kernel launch
    dt, n_steps = 0.01, 200
    yT = jax.block_until_ready(model.integrate_euler(y, dt, n_steps))

    def _euler_body(_, s):
        Sx, Ix, Rx = s[0], s[1], s[2]
        dSx = -beta * Sx * Ix
        dRx = gamma * Ix
        dIx = -dSx - dRx
        return jnp.stack([Sx + dt * dSx, Ix + dt * dIx, Rx + dt * dRx])

    ref_T = lax.fori_loop(0, n_steps, _euler_body, y)
    assert yT.shape == (3,) and yT.dtype == jnp.float32
    assert jnp.allclose(yT, ref_T, atol=1e-4, rtol=1e-4)

    # 4) fused batched Euler integration: per-tile state stays on-chip for all
    #    n_steps; HBM read/written once per tile.
    ybT = jax.block_until_ready(model.integrate_euler(yb, dt, n_steps))
    refb_T = lax.fori_loop(0, n_steps, _euler_body, yb)  # broadcasts over B
    assert ybT.shape == (3, B) and ybT.dtype == jnp.float32
    assert jnp.allclose(ybT, refb_T, atol=1e-4, rtol=1e-4)

    print("KERNEL_OK")
</pallas_src>

<mosaic_0001>
module attributes {stable_mosaic.version = 11 : i64} {
  func.func @_scalar_deriv_kernel(%arg0: memref<3xf32, #tpu.memory_space<smem>>, %arg1: memref<3xf32, #tpu.memory_space<smem>>) attributes {dimension_semantics = [], scalar_prefetch = 0 : i64, scratch_operands = 0 : i64, tpu.core_type = #tpu.core_type<tc>} {
    %c0 = arith.constant 0 : index
    %0 = memref.load %arg0[%c0] : memref<3xf32, #tpu.memory_space<smem>>
    %c1 = arith.constant 1 : index
    %1 = memref.load %arg0[%c1] : memref<3xf32, #tpu.memory_space<smem>>
    %cst = arith.constant -3.000000e-01 : f32
    %2 = arith.mulf %cst, %0 : f32
    %3 = arith.mulf %2, %1 : f32
    %cst_0 = arith.constant 1.000000e-01 : f32
    %4 = arith.mulf %cst_0, %1 : f32
    %cst_1 = arith.constant 0.000000e+00 : f32
    %5 = arith.subf %cst_1, %3 : f32
    %6 = arith.subf %5, %4 : f32
    %c0_2 = arith.constant 0 : index
    %7 = memref.load %arg1[%c0_2] : memref<3xf32, #tpu.memory_space<smem>>
    memref.store %3, %arg1[%c0_2] : memref<3xf32, #tpu.memory_space<smem>>
    %c1_3 = arith.constant 1 : index
    %8 = memref.load %arg1[%c1_3] : memref<3xf32, #tpu.memory_space<smem>>
    memref.store %6, %arg1[%c1_3] : memref<3xf32, #tpu.memory_space<smem>>
    %c2 = arith.constant 2 : index
    %9 = memref.load %arg1[%c2] : memref<3xf32, #tpu.memory_space<smem>>
    memref.store %4, %arg1[%c2] : memref<3xf32, #tpu.memory_space<smem>>
    return
  }
}

</mosaic_0001>

<bundles_post_ra>
// kernel: tpu_custom_call.1
= control target key start
LH: loop header
LB: loop body
LE: loop exit
PB: predicated region body
PF: predicated region fallthrough
CT: control target
= control target key end

     0   :  { %6 = vsyncpa [#allocation3], 0  ;;  %s100_s0 = inlined_call_operand.hbm [shape: f32[3], index: 0, kind: input, shape index: {}]   ;;  %s101_s1 = inlined_call_operand.hbm [shape: f32[3], index: 1, kind: output, shape index: {}]  }
   0x1   :  { %7 = vsyncpa [#allocation4], 0  ;;  %s13_s8 = sshll.u32 %s100_s0, 4  ;;  %s82_s9 = smov [#allocation2]   ;;  %s14_s8 = int_to_ptr.hbm [resolvable:$true] %s13_s8 }
   0x2   :  { %16 = dma.hbm_to_smem %s14_s8, 16, %s82_s9, [#allocation3]  }
   0x3   :  { %78 = dma.done.wait [#allocation3], 16  }
   0x4   :  { %79 = vsyncadd [#allocation3], 4294967280 }
   0x5   :  { %21 = sfence }
   0x6   :  { %s22_s10 = sld [smem:[#allocation2]]  ;;  %s40_s17 = sshll.u32 %s101_s1, 4  ;;  %s41_s17 = int_to_ptr.hbm [resolvable:$true] %s40_s17 }
   0x7   :  { %s51_s11 = sld [smem:[#allocation2 + $0x1]]  ;;  %s83_s19 = smov [#allocation5]  }
   0xc   :  { %s24_s12 = smul.f32 -0.3, %s22_s10 }
   0xd   :  { %s26_s13 = smul.f32 0.1, %s51_s11 }
   0xe   :  { %s25_s14 = smul.f32 %s51_s11, %s24_s12 }
   0xf   :  { %34 = sst [smem:[#allocation5 + $0x2]] %s26_s13 }
  0x10   :  { %s27_s18 = ssub.f32 0.0, %s25_s14 }
  0x11   :  { %30 = sst [smem:[#allocation5]] %s25_s14 }
  0x12   :  { %s28_s0 = ssub.f32 %s27_s18, %s26_s13 }
  0x14   :  { %32 = sst [smem:[#allocation5 + $0x1]] %s28_s0 }
  0x15   :  { %43 = dma.smem_to_hbm %s83_s19, 16, %s41_s17, [#allocation4]  }
  0x16   :  { %80 = dma.done.wait [#allocation4], 16  }
  0x17   :  { %81 = vsyncadd [#allocation4], 4294967280 }
  0x18   :  { %48 = sfence }
  0x19   :  { %49 = vsyncpa [#allocation3], 1 }
  0x1a   :  { %50 = vsyncpa [#allocation4], 1 }

</bundles_post_ra>
